<compile_context>
chip_gen: v6e
topology: v6e:2x2x1
jax: 0.10.0
libtpu: 0.0.40
codegen_flags: <defaults>
</compile_context>

<pallas_src>
import functools

import jax
import jax.numpy as jnp
import numpy as np
from jax.experimental import pallas as pl
from jax.experimental.pallas import tpu as pltpu

_LANES = 128   # lane width; each slab row holds 64 interleaved samples
_MIN_TB = 256  # only split the grid for multi-core once there is real work


def _comparison_kernel(x_ref, tab_ref, o_ref, *, nh):
    """x_ref: (TB, 128) interleaved (x0,x1,x0,x1,...).  o_ref: same layout.

    tab_ref rows: [0:nh]=u (own coeff), [nh:2nh]=v (partner coeff),
                  [2nh:3nh]=b1, [3nh:4nh]=s (output coeff), [4nh]=t (output bias).
    """
    x = x_ref[...]                                   # (TB, 128)
    L = x.shape[-1]                                  # 128

    # ---- pair-partner extraction (even lane <-> odd lane of the same sample) ----
    # Probe the rotate convention on a SINGLE (1,128) vreg (not the full block),
    # then do one select over the block. Rolls run on the XLU slot (idle here).
    lane = jax.lax.broadcasted_iota(jnp.int32, (1, L), 1)          # (1,128)
    is_even = (lane % 2) == 0
    is_prev = pltpu.roll(lane, 1, 1) == ((lane - 1) % L)           # uniform T/F
    take_r1 = jnp.logical_xor(is_even, is_prev)                    # (1,128) bool

    r1 = pltpu.roll(x, 1, 1)
    r2 = pltpu.roll(x, L - 1, 1)
    # even lane wants its "next" lane, odd lane wants its "previous" lane
    partner = jnp.where(take_r1, r1, r2)                           # (TB,128)

    # ---- 2 -> NH -> 2 MLP entirely on the VPU with per-lane coefficients ----
    # h_j = relu(x*u_j + partner*v_j + b1_j); out = relu(sum_j h_j*s_j + t)
    acc = jnp.zeros_like(x)
    for j in range(nh):                              # static unroll (nh == 10)
        u = tab_ref[j:j + 1, :]
        v = tab_ref[nh + j:nh + j + 1, :]
        b = tab_ref[2 * nh + j:2 * nh + j + 1, :]
        s = tab_ref[3 * nh + j:3 * nh + j + 1, :]
        h = jnp.maximum(x * u + partner * v + b, 0)
        acc = acc + h * s
    t = tab_ref[4 * nh:4 * nh + 1, :]
    o_ref[...] = jnp.maximum(acc + t, 0).astype(o_ref.dtype)


def _choose_tiling(total, block_rows, min_steps):
    """Pick (rows_pad, tb, grid_steps) for a lane-dense (rows, 128) slab."""
    rows = -(-total // _LANES)
    rows8 = max(8, -(-rows // 8) * 8)
    tb0 = max(8, min(block_rows, rows8))
    g = -(-rows8 // tb0)
    # v7x: make sure both TensorCores get work once the problem is big enough.
    if min_steps > 1 and rows8 >= min_steps * _MIN_TB:
        g = max(g, min_steps)
    rows_per_step = -(-rows8 // g)
    tb = -(-rows_per_step // 8) * 8
    rows_pad = g * tb
    return rows_pad, tb, g


def comparison_net_cold(x, params, *, block_rows=2048, min_steps=2,
                        compute_dtype=jnp.float32):
    """Pallas forward of Comparison_Net_Cold.

    x: any shape with an even number of elements (matches torch .view(-1, 2)).
    params = (w1:(2,NH), b1:(NH,), w2:(NH,2), b2:(2,)).  Returns (M, 2) f32.
    compute_dtype=jnp.bfloat16 enables the faster packed-bf16 path on v6e/v7x
    (lower precision); keep float32 on v5e.
    """
    w1, b1, w2, b2 = (jnp.asarray(p, jnp.float32) for p in params)
    nh = w1.shape[1]

    flat = jnp.asarray(x, jnp.float32).reshape(-1)    # row-major == .view(-1, 2)
    total = flat.shape[0]
    assert total % 2 == 0, "total element count must be even (view(-1, 2))"
    m = total // 2

    rows_pad, tb, g = _choose_tiling(total, block_rows, min_steps)

    pad = rows_pad * _LANES - total
    if pad:
        xs = jnp.pad(flat, (0, pad)).reshape(rows_pad, _LANES)
    else:
        xs = flat.reshape(rows_pad, _LANES)           # zero-copy reshape
    xs = xs.astype(compute_dtype)

    # Per-lane coefficient tables: even lanes = component 0, odd lanes = component 1.
    even = (jnp.arange(_LANES) % 2 == 0)[None, :]                     # (1,128)
    u_tab = jnp.where(even, w1[0][:, None], w1[1][:, None])           # (NH,128)
    v_tab = jnp.where(even, w1[1][:, None], w1[0][:, None])           # (NH,128)
    b1_tab = jnp.broadcast_to(b1[:, None], (nh, _LANES))              # (NH,128)
    s_tab = jnp.where(even, w2[:, 0][:, None], w2[:, 1][:, None])     # (NH,128)
    t_tab = jnp.where(even, b2[0], b2[1])                             # (1,128)
    tab = jnp.concatenate([u_tab, v_tab, b1_tab, s_tab, t_tab],
                          axis=0).astype(compute_dtype)               # (4NH+1,128)

    itemsize = jnp.dtype(compute_dtype).itemsize
    cost = pl.CostEstimate(
        flops=80 * rows_pad * _LANES,
        transcendentals=0,
        bytes_accessed=(rows_pad * _LANES * (itemsize + 4)
                        + tab.shape[0] * _LANES * itemsize))

    out = pl.pallas_call(
        functools.partial(_comparison_kernel, nh=nh),
        out_shape=jax.ShapeDtypeStruct((rows_pad, _LANES), jnp.float32),
        grid=(g,),
        in_specs=[
            pl.BlockSpec((tb, _LANES), lambda i: (i, 0)),
            pl.BlockSpec(tab.shape, lambda i: (0, 0)),
        ],
        out_specs=pl.BlockSpec((tb, _LANES), lambda i: (i, 0)),
        compiler_params=pltpu.CompilerParams(dimension_semantics=("parallel",)),
        cost_estimate=cost,
    )(xs, tab)

    return out.reshape(-1)[: total].reshape(m, 2)


def comparison_net_cold_reference(x, params):
    """Pure-JAX mirror of the PyTorch forward."""
    w1, b1, w2, b2 = (jnp.asarray(p, jnp.float32) for p in params)
    v = jnp.asarray(x, jnp.float32).reshape(-1, 2)
    h = jnp.maximum(v @ w1 + b1, 0.0)
    return jnp.maximum(h @ w2 + b2, 0.0)


def make_params(key, nh=10, n_out=2):
    k1, k2, k3, k4 = jax.random.split(key, 4)
    w1 = jax.random.normal(k1, (2, nh), jnp.float32) * 0.5      # lin1.weight.T
    b1 = jax.random.normal(k2, (nh,), jnp.float32) * 0.1        # lin1.bias
    w2 = jax.random.normal(k3, (nh, n_out), jnp.float32) * 0.5  # lin2.weight.T
    b2 = jax.random.normal(k4, (n_out,), jnp.float32) * 0.1     # lin2.bias
    return w1, b1, w2, b2


if __name__ == "__main__":
    key = jax.random.PRNGKey(0)
    k_x, k_p = jax.random.split(key)
    params = make_params(k_p)

    # small primary check (padding path) + two extra sizes covering the
    # zero-copy no-pad path and a multi-row ragged case.
    for batch in (8, 512, 1000):
        xb = jax.random.uniform(k_x, (batch, 2), jnp.float32, 0.0, 9.0)
        out = jax.block_until_ready(comparison_net_cold(xb, params))
        ref = comparison_net_cold_reference(xb, params)
        np.testing.assert_allclose(np.asarray(out), np.asarray(ref),
                                   rtol=1e-5, atol=1e-5)

    print("KERNEL_OK")
</pallas_src>

<mosaic_0001>
module attributes {stable_mosaic.version = 11 : i64} {
  func.func @_comparison_kernel(%arg0: i32, %arg1: memref<8x128xf32, #tpu.memory_space<vmem>>, %arg2: memref<41x128xf32, #tpu.memory_space<vmem>>, %arg3: memref<8x128xf32, #tpu.memory_space<vmem>>) attributes {dimension_semantics = [#tpu.dimension_semantics<parallel>], iteration_bounds = array<i64: 1>, scalar_prefetch = 0 : i64, scratch_operands = 0 : i64, tpu.core_type = #tpu.core_type<tc>, window_params = [{transform_indices = @transform_0, window_bounds = array<i64: 8, 128>}, {pipeline_mode = #tpu.pipeline_mode<synchronous>, transform_indices = @transform_1, window_bounds = array<i64: 41, 128>}, {transform_indices = @transform_2, window_bounds = array<i64: 8, 128>}]} {
    %c0 = arith.constant 0 : index
    %c0_0 = arith.constant 0 : index
    %0 = vector.load %arg1[%c0, %c0_0] : memref<8x128xf32, #tpu.memory_space<vmem>>, vector<8x128xf32>
    %1 = tpu.iota {dimensions = array<i32: 1>} : vector<1x128xi32>
    %c2_i32 = arith.constant 2 : i32
    %c0_i32 = arith.constant 0 : i32
    %2 = arith.cmpi eq, %c2_i32, %c0_i32 : i32
    %c1_i32 = arith.constant 1 : i32
    %3 = arith.select %2, %c1_i32, %c2_i32 : i32
    %4 = vector.broadcast %3 : i32 to vector<1x128xi32>
    %5 = arith.remsi %1, %4 : vector<1x128xi32>
    %c0_i32_1 = arith.constant 0 : i32
    %6 = vector.broadcast %c0_i32_1 : i32 to vector<1x128xi32>
    %7 = arith.cmpi ne, %5, %6 : vector<1x128xi32>
    %c0_i32_2 = arith.constant 0 : i32
    %8 = vector.broadcast %c0_i32_2 : i32 to vector<1x128xi32>
    %9 = arith.cmpi slt, %5, %8 : vector<1x128xi32>
    %c0_i32_3 = arith.constant 0 : i32
    %10 = arith.cmpi slt, %3, %c0_i32_3 : i32
    %11 = vector.broadcast %10 : i1 to vector<1x128xi1>
    %12 = vector.broadcast %11 : vector<1x128xi1> to vector<1x128xi1>
    %13 = arith.xori %9, %12 : vector<1x128xi1>
    %14 = arith.andi %13, %7 : vector<1x128xi1>
    %15 = vector.broadcast %3 : i32 to vector<1x128xi32>
    %16 = arith.addi %5, %15 : vector<1x128xi32>
    %17 = arith.select %14, %16, %5 : vector<1x128xi1>, vector<1x128xi32>
    %c0_i32_4 = arith.constant 0 : i32
    %18 = vector.broadcast %c0_i32_4 : i32 to vector<1x128xi32>
    %19 = arith.cmpi eq, %17, %18 : vector<1x128xi32>
    %c1_i32_5 = arith.constant 1 : i32
    %20 = tpu.dynamic_rotate %1 by %c1_i32_5 dim 1 : vector<1x128xi32>, i32 -> vector<1x128xi32>
    %c1_i32_6 = arith.constant 1 : i32
    %21 = vector.broadcast %c1_i32_6 : i32 to vector<1x128xi32>
    %22 = arith.subi %1, %21 : vector<1x128xi32>
    %c128_i32 = arith.constant 128 : i32
    %c0_i32_7 = arith.constant 0 : i32
    %23 = arith.cmpi eq, %c128_i32, %c0_i32_7 : i32
    %c1_i32_8 = arith.constant 1 : i32
    %24 = arith.select %23, %c1_i32_8, %c128_i32 : i32
    %25 = vector.broadcast %24 : i32 to vector<1x128xi32>
    %26 = arith.remsi %22, %25 : vector<1x128xi32>
    %c0_i32_9 = arith.constant 0 : i32
    %27 = vector.broadcast %c0_i32_9 : i32 to vector<1x128xi32>
    %28 = arith.cmpi ne, %26, %27 : vector<1x128xi32>
    %c0_i32_10 = arith.constant 0 : i32
    %29 = vector.broadcast %c0_i32_10 : i32 to vector<1x128xi32>
    %30 = arith.cmpi slt, %26, %29 : vector<1x128xi32>
    %c0_i32_11 = arith.constant 0 : i32
    %31 = arith.cmpi slt, %24, %c0_i32_11 : i32
    %32 = vector.broadcast %31 : i1 to vector<1x128xi1>
    %33 = vector.broadcast %32 : vector<1x128xi1> to vector<1x128xi1>
    %34 = arith.xori %30, %33 : vector<1x128xi1>
    %35 = arith.andi %34, %28 : vector<1x128xi1>
    %36 = vector.broadcast %24 : i32 to vector<1x128xi32>
    %37 = arith.addi %26, %36 : vector<1x128xi32>
    %38 = arith.select %35, %37, %26 : vector<1x128xi1>, vector<1x128xi32>
    %39 = arith.cmpi eq, %20, %38 : vector<1x128xi32>
    %40 = arith.xori %19, %39 : vector<1x128xi1>
    %c1_i32_12 = arith.constant 1 : i32
    %41 = tpu.dynamic_rotate %0 by %c1_i32_12 dim 1 : vector<8x128xf32>, i32 -> vector<8x128xf32>
    %c127_i32 = arith.constant 127 : i32
    %42 = tpu.dynamic_rotate %0 by %c127_i32 dim 1 : vector<8x128xf32>, i32 -> vector<8x128xf32>
    %43 = vector.shape_cast %40 : vector<1x128xi1> to vector<1x128xi1>
    %44 = vector.broadcast %43 : vector<1x128xi1> to vector<8x128xi1>
    %45 = arith.select %44, %41, %42 : vector<8x128xi1>, vector<8x128xf32>
    %cst = arith.constant 0.000000e+00 : f32
    %46 = vector.broadcast %cst : f32 to vector<8x128xf32>
    %c0_13 = arith.constant 0 : index
    %c0_14 = arith.constant 0 : index
    %47 = vector.load %arg2[%c0_13, %c0_14] : memref<41x128xf32, #tpu.memory_space<vmem>>, vector<1x128xf32>
    %c10 = arith.constant 10 : index
    %c0_15 = arith.constant 0 : index
    %48 = vector.load %arg2[%c10, %c0_15] : memref<41x128xf32, #tpu.memory_space<vmem>>, vector<1x128xf32>
    %c20 = arith.constant 20 : index
    %c0_16 = arith.constant 0 : index
    %49 = vector.load %arg2[%c20, %c0_16] : memref<41x128xf32, #tpu.memory_space<vmem>>, vector<1x128xf32>
    %c30 = arith.constant 30 : index
    %c0_17 = arith.constant 0 : index
    %50 = vector.load %arg2[%c30, %c0_17] : memref<41x128xf32, #tpu.memory_space<vmem>>, vector<1x128xf32>
    %51 = vector.broadcast %47 : vector<1x128xf32> to vector<8x128xf32>
    %52 = arith.mulf %0, %51 : vector<8x128xf32>
    %53 = vector.broadcast %48 : vector<1x128xf32> to vector<8x128xf32>
    %54 = arith.mulf %45, %53 : vector<8x128xf32>
    %55 = arith.addf %52, %54 : vector<8x128xf32>
    %56 = vector.broadcast %49 : vector<1x128xf32> to vector<8x128xf32>
    %57 = arith.addf %55, %56 : vector<8x128xf32>
    %cst_18 = arith.constant 0.000000e+00 : f32
    %58 = vector.broadcast %cst_18 : f32 to vector<8x128xf32>
    %59 = arith.maximumf %57, %58 : vector<8x128xf32>
    %60 = vector.broadcast %50 : vector<1x128xf32> to vector<8x128xf32>
    %61 = arith.mulf %59, %60 : vector<8x128xf32>
    %62 = arith.addf %46, %61 : vector<8x128xf32>
    %c1 = arith.constant 1 : index
    %c0_19 = arith.constant 0 : index
    %63 = vector.load %arg2[%c1, %c0_19] : memref<41x128xf32, #tpu.memory_space<vmem>>, vector<1x128xf32>
    %c11 = arith.constant 11 : index
    %c0_20 = arith.constant 0 : index
    %64 = vector.load %arg2[%c11, %c0_20] : memref<41x128xf32, #tpu.memory_space<vmem>>, vector<1x128xf32>
    %c21 = arith.constant 21 : index
    %c0_21 = arith.constant 0 : index
    %65 = vector.load %arg2[%c21, %c0_21] : memref<41x128xf32, #tpu.memory_space<vmem>>, vector<1x128xf32>
    %c31 = arith.constant 31 : index
    %c0_22 = arith.constant 0 : index
    %66 = vector.load %arg2[%c31, %c0_22] : memref<41x128xf32, #tpu.memory_space<vmem>>, vector<1x128xf32>
    %67 = vector.broadcast %63 : vector<1x128xf32> to vector<8x128xf32>
    %68 = arith.mulf %0, %67 : vector<8x128xf32>
    %69 = vector.broadcast %64 : vector<1x128xf32> to vector<8x128xf32>
    %70 = arith.mulf %45, %69 : vector<8x128xf32>
    %71 = arith.addf %68, %70 : vector<8x128xf32>
    %72 = vector.broadcast %65 : vector<1x128xf32> to vector<8x128xf32>
    %73 = arith.addf %71, %72 : vector<8x128xf32>
    %cst_23 = arith.constant 0.000000e+00 : f32
    %74 = vector.broadcast %cst_23 : f32 to vector<8x128xf32>
    %75 = arith.maximumf %73, %74 : vector<8x128xf32>
    %76 = vector.broadcast %66 : vector<1x128xf32> to vector<8x128xf32>
    %77 = arith.mulf %75, %76 : vector<8x128xf32>
    %78 = arith.addf %62, %77 : vector<8x128xf32>
    %c2 = arith.constant 2 : index
    %c0_24 = arith.constant 0 : index
    %79 = vector.load %arg2[%c2, %c0_24] : memref<41x128xf32, #tpu.memory_space<vmem>>, vector<1x128xf32>
    %c12 = arith.constant 12 : index
    %c0_25 = arith.constant 0 : index
    %80 = vector.load %arg2[%c12, %c0_25] : memref<41x128xf32, #tpu.memory_space<vmem>>, vector<1x128xf32>
    %c22 = arith.constant 22 : index
    %c0_26 = arith.constant 0 : index
    %81 = vector.load %arg2[%c22, %c0_26] : memref<41x128xf32, #tpu.memory_space<vmem>>, vector<1x128xf32>
    %c32 = arith.constant 32 : index
    %c0_27 = arith.constant 0 : index
    %82 = vector.load %arg2[%c32, %c0_27] : memref<41x128xf32, #tpu.memory_space<vmem>>, vector<1x128xf32>
    %83 = vector.broadcast %79 : vector<1x128xf32> to vector<8x128xf32>
    %84 = arith.mulf %0, %83 : vector<8x128xf32>
    %85 = vector.broadcast %80 : vector<1x128xf32> to vector<8x128xf32>
    %86 = arith.mulf %45, %85 : vector<8x128xf32>
    %87 = arith.addf %84, %86 : vector<8x128xf32>
    %88 = vector.broadcast %81 : vector<1x128xf32> to vector<8x128xf32>
    %89 = arith.addf %87, %88 : vector<8x128xf32>
    %cst_28 = arith.constant 0.000000e+00 : f32
    %90 = vector.broadcast %cst_28 : f32 to vector<8x128xf32>
    %91 = arith.maximumf %89, %90 : vector<8x128xf32>
    %92 = vector.broadcast %82 : vector<1x128xf32> to vector<8x128xf32>
    %93 = arith.mulf %91, %92 : vector<8x128xf32>
    %94 = arith.addf %78, %93 : vector<8x128xf32>
    %c3 = arith.constant 3 : index
    %c0_29 = arith.constant 0 : index
    %95 = vector.load %arg2[%c3, %c0_29] : memref<41x128xf32, #tpu.memory_space<vmem>>, vector<1x128xf32>
    %c13 = arith.constant 13 : index
    %c0_30 = arith.constant 0 : index
    %96 = vector.load %arg2[%c13, %c0_30] : memref<41x128xf32, #tpu.memory_space<vmem>>, vector<1x128xf32>
    %c23 = arith.constant 23 : index
    %c0_31 = arith.constant 0 : index
    %97 = vector.load %arg2[%c23, %c0_31] : memref<41x128xf32, #tpu.memory_space<vmem>>, vector<1x128xf32>
    %c33 = arith.constant 33 : index
    %c0_32 = arith.constant 0 : index
    %98 = vector.load %arg2[%c33, %c0_32] : memref<41x128xf32, #tpu.memory_space<vmem>>, vector<1x128xf32>
    %99 = vector.broadcast %95 : vector<1x128xf32> to vector<8x128xf32>
    %100 = arith.mulf %0, %99 : vector<8x128xf32>
    %101 = vector.broadcast %96 : vector<1x128xf32> to vector<8x128xf32>
    %102 = arith.mulf %45, %101 : vector<8x128xf32>
    %103 = arith.addf %100, %102 : vector<8x128xf32>
    %104 = vector.broadcast %97 : vector<1x128xf32> to vector<8x128xf32>
    %105 = arith.addf %103, %104 : vector<8x128xf32>
    %cst_33 = arith.constant 0.000000e+00 : f32
    %106 = vector.broadcast %cst_33 : f32 to vector<8x128xf32>
    %107 = arith.maximumf %105, %106 : vector<8x128xf32>
    %108 = vector.broadcast %98 : vector<1x128xf32> to vector<8x128xf32>
    %109 = arith.mulf %107, %108 : vector<8x128xf32>
    %110 = arith.addf %94, %109 : vector<8x128xf32>
    %c4 = arith.constant 4 : index
    %c0_34 = arith.constant 0 : index
    %111 = vector.load %arg2[%c4, %c0_34] : memref<41x128xf32, #tpu.memory_space<vmem>>, vector<1x128xf32>
    %c14 = arith.constant 14 : index
    %c0_35 = arith.constant 0 : index
    %112 = vector.load %arg2[%c14, %c0_35] : memref<41x128xf32, #tpu.memory_space<vmem>>, vector<1x128xf32>
    %c24 = arith.constant 24 : index
    %c0_36 = arith.constant 0 : index
    %113 = vector.load %arg2[%c24, %c0_36] : memref<41x128xf32, #tpu.memory_space<vmem>>, vector<1x128xf32>
    %c34 = arith.constant 34 : index
    %c0_37 = arith.constant 0 : index
    %114 = vector.load %arg2[%c34, %c0_37] : memref<41x128xf32, #tpu.memory_space<vmem>>, vector<1x128xf32>
    %115 = vector.broadcast %111 : vector<1x128xf32> to vector<8x128xf32>
    %116 = arith.mulf %0, %115 : vector<8x128xf32>
    %117 = vector.broadcast %112 : vector<1x128xf32> to vector<8x128xf32>
    %118 = arith.mulf %45, %117 : vector<8x128xf32>
    %119 = arith.addf %116, %118 : vector<8x128xf32>
    %120 = vector.broadcast %113 : vector<1x128xf32> to vector<8x128xf32>
    %121 = arith.addf %119, %120 : vector<8x128xf32>
    %cst_38 = arith.constant 0.000000e+00 : f32
    %122 = vector.broadcast %cst_38 : f32 to vector<8x128xf32>
    %123 = arith.maximumf %121, %122 : vector<8x128xf32>
    %124 = vector.broadcast %114 : vector<1x128xf32> to vector<8x128xf32>
    %125 = arith.mulf %123, %124 : vector<8x128xf32>
    %126 = arith.addf %110, %125 : vector<8x128xf32>
    %c5 = arith.constant 5 : index
    %c0_39 = arith.constant 0 : index
    %127 = vector.load %arg2[%c5, %c0_39] : memref<41x128xf32, #tpu.memory_space<vmem>>, vector<1x128xf32>
    %c15 = arith.constant 15 : index
    %c0_40 = arith.constant 0 : index
    %128 = vector.load %arg2[%c15, %c0_40] : memref<41x128xf32, #tpu.memory_space<vmem>>, vector<1x128xf32>
    %c25 = arith.constant 25 : index
    %c0_41 = arith.constant 0 : index
    %129 = vector.load %arg2[%c25, %c0_41] : memref<41x128xf32, #tpu.memory_space<vmem>>, vector<1x128xf32>
    %c35 = arith.constant 35 : index
    %c0_42 = arith.constant 0 : index
    %130 = vector.load %arg2[%c35, %c0_42] : memref<41x128xf32, #tpu.memory_space<vmem>>, vector<1x128xf32>
    %131 = vector.broadcast %127 : vector<1x128xf32> to vector<8x128xf32>
    %132 = arith.mulf %0, %131 : vector<8x128xf32>
    %133 = vector.broadcast %128 : vector<1x128xf32> to vector<8x128xf32>
    %134 = arith.mulf %45, %133 : vector<8x128xf32>
    %135 = arith.addf %132, %134 : vector<8x128xf32>
    %136 = vector.broadcast %129 : vector<1x128xf32> to vector<8x128xf32>
    %137 = arith.addf %135, %136 : vector<8x128xf32>
    %cst_43 = arith.constant 0.000000e+00 : f32
    %138 = vector.broadcast %cst_43 : f32 to vector<8x128xf32>
    %139 = arith.maximumf %137, %138 : vector<8x128xf32>
    %140 = vector.broadcast %130 : vector<1x128xf32> to vector<8x128xf32>
    %141 = arith.mulf %139, %140 : vector<8x128xf32>
    %142 = arith.addf %126, %141 : vector<8x128xf32>
    %c6 = arith.constant 6 : index
    %c0_44 = arith.constant 0 : index
    %143 = vector.load %arg2[%c6, %c0_44] : memref<41x128xf32, #tpu.memory_space<vmem>>, vector<1x128xf32>
    %c16 = arith.constant 16 : index
    %c0_45 = arith.constant 0 : index
    %144 = vector.load %arg2[%c16, %c0_45] : memref<41x128xf32, #tpu.memory_space<vmem>>, vector<1x128xf32>
    %c26 = arith.constant 26 : index
    %c0_46 = arith.constant 0 : index
    %145 = vector.load %arg2[%c26, %c0_46] : memref<41x128xf32, #tpu.memory_space<vmem>>, vector<1x128xf32>
    %c36 = arith.constant 36 : index
    %c0_47 = arith.constant 0 : index
    %146 = vector.load %arg2[%c36, %c0_47] : memref<41x128xf32, #tpu.memory_space<vmem>>, vector<1x128xf32>
    %147 = vector.broadcast %143 : vector<1x128xf32> to vector<8x128xf32>
    %148 = arith.mulf %0, %147 : vector<8x128xf32>
    %149 = vector.broadcast %144 : vector<1x128xf32> to vector<8x128xf32>
    %150 = arith.mulf %45, %149 : vector<8x128xf32>
    %151 = arith.addf %148, %150 : vector<8x128xf32>
    %152 = vector.broadcast %145 : vector<1x128xf32> to vector<8x128xf32>
    %153 = arith.addf %151, %152 : vector<8x128xf32>
    %cst_48 = arith.constant 0.000000e+00 : f32
    %154 = vector.broadcast %cst_48 : f32 to vector<8x128xf32>
    %155 = arith.maximumf %153, %154 : vector<8x128xf32>
    %156 = vector.broadcast %146 : vector<1x128xf32> to vector<8x128xf32>
    %157 = arith.mulf %155, %156 : vector<8x128xf32>
    %158 = arith.addf %142, %157 : vector<8x128xf32>
    %c7 = arith.constant 7 : index
    %c0_49 = arith.constant 0 : index
    %159 = vector.load %arg2[%c7, %c0_49] : memref<41x128xf32, #tpu.memory_space<vmem>>, vector<1x128xf32>
    %c17 = arith.constant 17 : index
    %c0_50 = arith.constant 0 : index
    %160 = vector.load %arg2[%c17, %c0_50] : memref<41x128xf32, #tpu.memory_space<vmem>>, vector<1x128xf32>
    %c27 = arith.constant 27 : index
    %c0_51 = arith.constant 0 : index
    %161 = vector.load %arg2[%c27, %c0_51] : memref<41x128xf32, #tpu.memory_space<vmem>>, vector<1x128xf32>
    %c37 = arith.constant 37 : index
    %c0_52 = arith.constant 0 : index
    %162 = vector.load %arg2[%c37, %c0_52] : memref<41x128xf32, #tpu.memory_space<vmem>>, vector<1x128xf32>
    %163 = vector.broadcast %159 : vector<1x128xf32> to vector<8x128xf32>
    %164 = arith.mulf %0, %163 : vector<8x128xf32>
    %165 = vector.broadcast %160 : vector<1x128xf32> to vector<8x128xf32>
    %166 = arith.mulf %45, %165 : vector<8x128xf32>
    %167 = arith.addf %164, %166 : vector<8x128xf32>
    %168 = vector.broadcast %161 : vector<1x128xf32> to vector<8x128xf32>
    %169 = arith.addf %167, %168 : vector<8x128xf32>
    %cst_53 = arith.constant 0.000000e+00 : f32
    %170 = vector.broadcast %cst_53 : f32 to vector<8x128xf32>
    %171 = arith.maximumf %169, %170 : vector<8x128xf32>
    %172 = vector.broadcast %162 : vector<1x128xf32> to vector<8x128xf32>
    %173 = arith.mulf %171, %172 : vector<8x128xf32>
    %174 = arith.addf %158, %173 : vector<8x128xf32>
    %c8 = arith.constant 8 : index
    %c0_54 = arith.constant 0 : index
    %175 = vector.load %arg2[%c8, %c0_54] : memref<41x128xf32, #tpu.memory_space<vmem>>, vector<1x128xf32>
    %c18 = arith.constant 18 : index
    %c0_55 = arith.constant 0 : index
    %176 = vector.load %arg2[%c18, %c0_55] : memref<41x128xf32, #tpu.memory_space<vmem>>, vector<1x128xf32>
    %c28 = arith.constant 28 : index
    %c0_56 = arith.constant 0 : index
    %177 = vector.load %arg2[%c28, %c0_56] : memref<41x128xf32, #tpu.memory_space<vmem>>, vector<1x128xf32>
    %c38 = arith.constant 38 : index
    %c0_57 = arith.constant 0 : index
    %178 = vector.load %arg2[%c38, %c0_57] : memref<41x128xf32, #tpu.memory_space<vmem>>, vector<1x128xf32>
    %179 = vector.broadcast %175 : vector<1x128xf32> to vector<8x128xf32>
    %180 = arith.mulf %0, %179 : vector<8x128xf32>
    %181 = vector.broadcast %176 : vector<1x128xf32> to vector<8x128xf32>
    %182 = arith.mulf %45, %181 : vector<8x128xf32>
    %183 = arith.addf %180, %182 : vector<8x128xf32>
    %184 = vector.broadcast %177 : vector<1x128xf32> to vector<8x128xf32>
    %185 = arith.addf %183, %184 : vector<8x128xf32>
    %cst_58 = arith.constant 0.000000e+00 : f32
    %186 = vector.broadcast %cst_58 : f32 to vector<8x128xf32>
    %187 = arith.maximumf %185, %186 : vector<8x128xf32>
    %188 = vector.broadcast %178 : vector<1x128xf32> to vector<8x128xf32>
    %189 = arith.mulf %187, %188 : vector<8x128xf32>
    %190 = arith.addf %174, %189 : vector<8x128xf32>
    %c9 = arith.constant 9 : index
    %c0_59 = arith.constant 0 : index
    %191 = vector.load %arg2[%c9, %c0_59] : memref<41x128xf32, #tpu.memory_space<vmem>>, vector<1x128xf32>
    %c19 = arith.constant 19 : index
    %c0_60 = arith.constant 0 : index
    %192 = vector.load %arg2[%c19, %c0_60] : memref<41x128xf32, #tpu.memory_space<vmem>>, vector<1x128xf32>
    %c29 = arith.constant 29 : index
    %c0_61 = arith.constant 0 : index
    %193 = vector.load %arg2[%c29, %c0_61] : memref<41x128xf32, #tpu.memory_space<vmem>>, vector<1x128xf32>
    %c39 = arith.constant 39 : index
    %c0_62 = arith.constant 0 : index
    %194 = vector.load %arg2[%c39, %c0_62] : memref<41x128xf32, #tpu.memory_space<vmem>>, vector<1x128xf32>
    %195 = vector.broadcast %191 : vector<1x128xf32> to vector<8x128xf32>
    %196 = arith.mulf %0, %195 : vector<8x128xf32>
    %197 = vector.broadcast %192 : vector<1x128xf32> to vector<8x128xf32>
    %198 = arith.mulf %45, %197 : vector<8x128xf32>
    %199 = arith.addf %196, %198 : vector<8x128xf32>
    %200 = vector.broadcast %193 : vector<1x128xf32> to vector<8x128xf32>
    %201 = arith.addf %199, %200 : vector<8x128xf32>
    %cst_63 = arith.constant 0.000000e+00 : f32
    %202 = vector.broadcast %cst_63 : f32 to vector<8x128xf32>
    %203 = arith.maximumf %201, %202 : vector<8x128xf32>
    %204 = vector.broadcast %194 : vector<1x128xf32> to vector<8x128xf32>
    %205 = arith.mulf %203, %204 : vector<8x128xf32>
    %206 = arith.addf %190, %205 : vector<8x128xf32>
    %c40 = arith.constant 40 : index
    %c0_64 = arith.constant 0 : index
    %207 = vector.load %arg2[%c40, %c0_64] : memref<41x128xf32, #tpu.memory_space<vmem>>, vector<1x128xf32>
    %208 = vector.broadcast %207 : vector<1x128xf32> to vector<8x128xf32>
    %209 = arith.addf %206, %208 : vector<8x128xf32>
    %cst_65 = arith.constant 0.000000e+00 : f32
    %210 = vector.broadcast %cst_65 : f32 to vector<8x128xf32>
    %211 = arith.maximumf %209, %210 : vector<8x128xf32>
    %c0_66 = arith.constant 0 : index
    %c0_67 = arith.constant 0 : index
    %212 = vector.load %arg3[%c0_66, %c0_67] : memref<8x128xf32, #tpu.memory_space<vmem>>, vector<8x128xf32>
    tpu.vector_store %arg3[%c0_66, %c0_67], %211 {strides = array<i32>} : memref<8x128xf32, #tpu.memory_space<vmem>>, vector<8x128xf32>,
    return
  }
  func.func @transform_0(%arg0: i32) -> (i32, i32) {
    %c0_i32 = arith.constant 0 : i32
    %c0_i32_0 = arith.constant 0 : i32
    return %arg0, %c0_i32 : i32, i32
  }
  func.func @transform_1(%arg0: i32) -> (i32, i32) {
    %c0_i32 = arith.constant 0 : i32
    %c0_i32_0 = arith.constant 0 : i32
    %c0_i32_1 = arith.constant 0 : i32
    return %c0_i32, %c0_i32_0 : i32, i32
  }
  func.func @transform_2(%arg0: i32) -> (i32, i32) {
    %c0_i32 = arith.constant 0 : i32
    %c0_i32_0 = arith.constant 0 : i32
    return %arg0, %c0_i32 : i32, i32
  }
}

</mosaic_0001>

<bundles_post_ra>
// kernel: tpu_custom_call.1
= control target key start
LH: loop header
LB: loop body
LE: loop exit
PB: predicated region body
PF: predicated region fallthrough
CT: control target
= control target key end

     0   :  { %7 = vsyncpa [#allocation3], 0  ;;  %s539_s0 = inlined_call_operand.hbm [shape: f32[8,128], index: 0, kind: input, shape index: {}]   ;;  %s540_s1 = inlined_call_operand.hbm [shape: f32[41,128], index: 1, kind: input, shape index: {}]   ;;  %s541_s2 = inlined_call_operand.hbm [shape: f32[8,128], index: 2, kind: output, shape index: {}]  }
   0x1   :  { %8 = vsyncpa [#allocation6], 0 }
   0x2   :  { %9 = vsyncpa [#allocation4], 0  ;;  %s493_s9 = smov [#allocation2]   ;;  %s494_s11 = smov [#allocation5]  }
   0x3   :  { %s16_s10 = sshll.u32 %s493_s9, 4  ;;  %s25_s12 = sshll.u32 %s494_s11, 4  ;;  %s17_s10 = int_to_ptr.vmem [resolvable:$true] %s16_s10  ;;  %s26_s12 = int_to_ptr.vmem [resolvable:$true] %s25_s12 }
   0x4   :  { %s435_s13 = scalar_lea.vmem %s17_s10, 128  ;;  %p440_p1 = scmp.lt.s32.totalorder %s17_s10, %s17_s10 }
   0x5   :  { %p436_p0 = scmp.ne.s32.totalorder %s17_s10, %s435_s13  ;;  %p441_p2 = scmp.lt.s32.totalorder %s435_s13, %s435_s13 }
   0x7   :  { %p442_p3 = por %p441_p2, %p440_p1 }
   0x9   :  { %p443_p4 = pnand %p442_p3, %p436_p0 }
   0xb   :  { %446 = shalt.err (!%p443_p4)
}
   0xc   :  { %19 = dma.hbm_to_vmem [thread:$0]  %s539_s0, 128, %s17_s10, [#allocation3]  }
   0xd   :  { %s455_s16 = scalar_lea.vmem %s26_s12, 768  ;;  %p460_p6 = scmp.lt.s32.totalorder %s26_s12, %s26_s12 }
   0xe   :  { %p456_p5 = scmp.ne.s32.totalorder %s26_s12, %s455_s16  ;;  %p461_p7 = scmp.lt.s32.totalorder %s455_s16, %s455_s16 }
  0x10   :  { %p462_p8 = por %p461_p7, %p460_p6 }
  0x12   :  { %p463_p9 = pnand %p462_p8, %p456_p5 }
  0x14   :  { %466 = shalt.err (!%p463_p9)
}
  0x15   :  { %s495_s17 = smov 128   ;;  %s496_s18 = smov 8  }
  0x16   :  { %31 = dma.hbm_to_vmem [thread:$0]  %s540_s1, 768, %s26_s12, [#allocation6], %s495_s17, %s495_s17, %s496_s18  }
  0x17   :  { %487 = dma.done.wait [#allocation3], 128  }
  0x18   :  { %488 = vsyncadd [#allocation3], 4294967168 }
  0x19   :  { %489 = dma.done.wait [#allocation6], 768  }
  0x1a   :  { %490 = vsyncadd [#allocation6], 4294966528  ;;  %v39_v0 = vlaneseq  ;;  %s497_s0 = smov 1   ;;  %v522_v2 = vld [vmem:[#allocation2] sm:$0xff]  ;;  %s498_s21 = smov 127   ;;  %v499_v18 = vmov 0  }
  0x1b   :  { %73 = vrot.lane.b32.xlu1 %v522_v2, %s498_s21  ;;  %v378_v15 = vld [vmem:[#allocation5] ss:$0 sm:$0xff]  ;;  %v382_v16 = vld [vmem:[#allocation5 + $0x1] ss:$0 sm:$0xff]  ;;  %v386_v17 = vld [vmem:[#allocation5 + $0x2] ss:$0 sm:$0xff] }
  0x1c   :  { %v40_v1 = vand.u32 127, %v39_v0  ;;  %v77_v11 = vshrl.u32 %v39_v0, 7  ;;  %v379_v20 = vld [vmem:[#allocation5 + $0xa] ss:$0 sm:$0xff]  ;;  %v383_v21 = vld [vmem:[#allocation5 + $0xb] ss:$0 sm:$0xff]  ;;  %v90_v31 = vmul.f32 %v378_v15, %v522_v2  ;;  %v117_v32 = vmul.f32 %v382_v16, %v522_v2 }
  0x1d   :  { %v387_v22 = vld [vmem:[#allocation5 + $0xc] ss:$0 sm:$0xff]  ;;  %v390_v23 = vld [vmem:[#allocation5 + $0x3] ss:$0 sm:$0xff]  ;;  %v394_v24 = vld [vmem:[#allocation5 + $0x4] ss:$0 sm:$0xff]  ;;  %v144_v36 = vmul.f32 %v386_v17, %v522_v2 }
  0x1e   :  { %54 = vrot.lane.b32.xlu0 %v40_v1, %s497_s0  ;;  %v376_v3 = vadd.s32 4294967295, %v40_v1  ;;  %v45_v10 = vand.u32 1, %v40_v1  ;;  %v78_v13 = vsub.s32 0, %v77_v11  ;;  %v398_v28 = vld [vmem:[#allocation5 + $0x5] ss:$0 sm:$0xff]  ;;  %v171_v37 = vmul.f32 %v390_v23, %v522_v2  ;;  %s500_s1 = smov [#allocation7]  }
  0x1f   :  { %v402_v29 = vld [vmem:[#allocation5 + $0x6] ss:$0 sm:$0xff]  ;;  %v406_v30 = vld [vmem:[#allocation5 + $0x7] ss:$0 sm:$0xff]  ;;  %v391_v33 = vld [vmem:[#allocation5 + $0xd] ss:$0 sm:$0xff]  ;;  %v198_v38 = vmul.f32 %v394_v24, %v522_v2  ;;  %v225_v42 = vmul.f32 %v398_v28, %v522_v2 }
  0x20   :  { %v58_v4 = vsub.s32 0, %v376_v3  ;;  %vm57_vm0 = vcmp.lt.s32.totalorder %v376_v3, 0  ;;  %vm53_vm4 = vcmp.eq.s32.totalorder %v45_v10, 0  ;;  %v395_v34 = vld [vmem:[#allocation5 + $0xe] ss:$0 sm:$0xff]  ;;  %v252_v43 = vmul.f32 %v402_v29, %v522_v2  ;;  %s366_s22 = sshll.u32 %s500_s1, 4  ;;  %s367_s22 = int_to_ptr.vmem [resolvable:$true] %s366_s22 }
  0x21   :  { %v399_v35 = vld [vmem:[#allocation5 + $0xf] ss:$0 sm:$0xff]  ;;  %v403_v39 = vld [vmem:[#allocation5 + $0x10] ss:$0 sm:$0xff]  ;;  %v407_v40 = vld [vmem:[#allocation5 + $0x11] ss:$0 sm:$0xff]  ;;  %v279_v44 = vmul.f32 %v406_v30, %v522_v2  ;;  %p472_p11 = scmp.lt.s32.totalorder %s367_s22, %s367_s22 }
  0x22   :  { %71 = vrot.lane.b32.xlu0 %v522_v2, %s497_s0  ;;  %v377_v5 = vmin.u32 %v376_v3, %v58_v4  ;;  %v380_v48 = vld [vmem:[#allocation5 + $0x14] ss:$0 sm:$0xff]  ;;  %v384_v50 = vld [vmem:[#allocation5 + $0x15] ss:$0 sm:$0xff]  ;;  %v388_v51 = vld [vmem:[#allocation5 + $0x16] ss:$0 sm:$0xff] }
  0x23   :  { %v392_v52 = vld [vmem:[#allocation5 + $0x17] ss:$0 sm:$0xff]  ;;  %v396_v61 = vld [vmem:[#allocation5 + $0x18] ss:$0 sm:$0xff]  ;;  %v385_v10 = vld [vmem:[#allocation5 + $0x1f] ss:$0 sm:$0xff] }
  0x24   :  { %v61_v6 = vand.u32 127, %v377_v5  ;;  %v404_v16 = vld [vmem:[#allocation5 + $0x1a] ss:$0 sm:$0xff]  ;;  %v389_v17 = vld [vmem:[#allocation5 + $0x20] ss:$0 sm:$0xff]  ;;  %s467_s23 = scalar_lea.vmem %s367_s22, 128 }
  0x25   :  { %p468_p10 = scmp.ne.s32.totalorder %s367_s22, %s467_s23  ;;  %p473_p12 = scmp.lt.s32.totalorder %s467_s23, %s467_s23 }
  0x26   :  { %v62_v7 = vsub.s32 0, %v61_v6 }
  0x27   :  { %p474_p13 = por %p473_p12, %p472_p11 }
  0x28   :  { %v63_v8 = vsel %vm57_vm0, %v62_v7, %v61_v6  ;;  %v400_v7 = vld [vmem:[#allocation5 + $0x19] ss:$0 sm:$0xff] }
  0x29   :  { %vm64_vm1 = vcmp.ne.s32.totalorder %v63_v8, 0  ;;  %vm65_vm2 = vcmp.lt.s32.totalorder %v63_v8, 0  ;;  %v67_v9 = vadd.s32 128, %v63_v8  ;;  %p475_p0 = pnand %p474_p13, %p468_p10 }
  0x2a   :  { %vm66_vm3 = vmand %vm65_vm2, %vm64_vm1 }
  0x2b   :  { %v68_v12 = vsel %vm66_vm3, %v67_v9, %v63_v8  ;;  %v410_v8 = vld [vmem:[#allocation5 + $0x8] ss:$0 sm:$0xff]  ;;  %v381_v9 = vld [vmem:[#allocation5 + $0x1e] ss:$0 sm:$0xff] }
  0x8d   :  { %v74_v26 = vpop.permute.xlu1 %73 }
  0x90   :  { %v55_v14 = vpop.permute.xlu0 %54 }
  0x91   :  { %vm69_vm5 = vcmp.eq.s32.totalorder %v55_v14, %v68_v12  ;;  %v414_v12 = vld [vmem:[#allocation5 + $0x9] ss:$0 sm:$0xff] }
  0x92   :  { %vm70_vm6 = vmxor %vm53_vm4, %vm69_vm5 }
  0x93   :  { %v75_v19 = vsel %vm70_vm6, 1, %v499_v18 }
  0x94   :  { %v79_v25 = vrot.slane %v75_v19, %v78_v13  ;;  %v72_v27 = vpop.permute.xlu0 %71  ;;  %v411_v19 = vld [vmem:[#allocation5 + $0x12] ss:$0 sm:$0xff] }
  0x96   :  { %vm80_vm7 = vcmp.eq.s32.totalorder %v79_v25, 1  ;;  %v408_v25 = vld [vmem:[#allocation5 + $0x1b] ss:$0 sm:$0xff] }
  0x97   :  { %v81_v41 = vsel %vm80_vm7, %v72_v27, %v74_v26  ;;  %v333_v26 = vmul.f32 %v414_v12, %v522_v2  ;;  %v393_v27 = vld [vmem:[#allocation5 + $0x21] ss:$0 sm:$0xff] }
  0x98   :  { %v95_v45 = vmul.f32 %v379_v20, %v81_v41  ;;  %v122_v46 = vmul.f32 %v383_v21, %v81_v41  ;;  %v149_v47 = vmul.f32 %v387_v22, %v81_v41  ;;  %v176_v49 = vmul.f32 %v391_v33, %v81_v41  ;;  %v415_v21 = vld [vmem:[#allocation5 + $0x13] ss:$0 sm:$0xff] }
  0x99   :  { %v203_v53 = vmul.f32 %v395_v34, %v81_v41  ;;  %v230_v54 = vmul.f32 %v399_v35, %v81_v41  ;;  %v257_v55 = vmul.f32 %v403_v39, %v81_v41  ;;  %v284_v56 = vmul.f32 %v407_v40, %v81_v41  ;;  %v397_v34 = vld [vmem:[#allocation5 + $0x22] ss:$0 sm:$0xff] }
  0x9a   :  { %v96_v57 = vadd.f32 %v95_v45, %v90_v31  ;;  %v123_v58 = vadd.f32 %v122_v46, %v117_v32  ;;  %v150_v59 = vadd.f32 %v149_v47, %v144_v36  ;;  %v177_v60 = vadd.f32 %v176_v49, %v171_v37  ;;  %v412_v37 = vld [vmem:[#allocation5 + $0x1c] ss:$0 sm:$0xff] }
  0x9b   :  { %v204_v62 = vadd.f32 %v203_v53, %v198_v38  ;;  %v231_v63 = vadd.f32 %v230_v54, %v225_v42  ;;  %v258_v0 = vadd.f32 %v257_v55, %v252_v43  ;;  %v285_v1 = vadd.f32 %v284_v56, %v279_v44  ;;  %v401_v43 = vld [vmem:[#allocation5 + $0x23] ss:$0 sm:$0xff]  ;;  %v416_v44 = vld [vmem:[#allocation5 + $0x1d] ss:$0 sm:$0xff]  ;;  %v413_v56 = vld [vmem:[#allocation5 + $0x26] ss:$0 sm:$0xff] }
  0x9c   :  { %v101_v3 = vadd.f32 %v380_v48, %v96_v57  ;;  %v128_v4 = vadd.f32 %v384_v50, %v123_v58  ;;  %v155_v5 = vadd.f32 %v388_v51, %v150_v59  ;;  %v182_v6 = vadd.f32 %v392_v52, %v177_v60  ;;  %v405_v48 = vld [vmem:[#allocation5 + $0x24] ss:$0 sm:$0xff]  ;;  %v417_v60 = vld [vmem:[#allocation5 + $0x27] ss:$0 sm:$0xff] }
  0x9d   :  { %v209_v11 = vadd.f32 %v396_v61, %v204_v62  ;;  %v236_v18 = vadd.f32 %v400_v7, %v231_v63  ;;  %v306_v20 = vmul.f32 %v410_v8, %v522_v2  ;;  %v263_v29 = vadd.f32 %v404_v16, %v258_v0 }
  0x9e   :  { %v102_v13 = vmax.f32 %v101_v3, 0.0  ;;  %v129_v14 = vmax.f32 %v128_v4, 0.0  ;;  %v156_v15 = vmax.f32 %v155_v5, 0.0  ;;  %v183_v24 = vmax.f32 %v182_v6, 0.0 }
  0x9f   :  { %v210_v28 = vmax.f32 %v209_v11, 0.0  ;;  %v311_v32 = vmul.f32 %v411_v19, %v81_v41  ;;  %v338_v33 = vmul.f32 %v415_v21, %v81_v41  ;;  %v237_v35 = vmax.f32 %v236_v18, 0.0  ;;  %v409_v41 = vld [vmem:[#allocation5 + $0x25] ss:$0 sm:$0xff] }
  0xa0   :  { %v107_v22 = vmul.f32 %v381_v9, %v102_v13  ;;  %v134_v23 = vmul.f32 %v385_v10, %v129_v14  ;;  %v161_v31 = vmul.f32 %v389_v17, %v156_v15  ;;  %v290_v36 = vadd.f32 %v408_v25, %v285_v1  ;;  %v418_v1 = vld [vmem:[#allocation5 + $0x28] ss:$0 sm:$0xff] }
  0xa1   :  { %v188_v39 = vmul.f32 %v393_v27, %v183_v24  ;;  %v312_v40 = vadd.f32 %v311_v32, %v306_v20  ;;  %v339_v42 = vadd.f32 %v338_v33, %v333_v26  ;;  %v215_v46 = vmul.f32 %v397_v34, %v210_v28 }
  0xa2   :  { %v135_v30 = vadd.f32 %v134_v23, %v107_v22  ;;  %v264_v2 = vmax.f32 %v263_v29, 0.0  ;;  %v242_v50 = vmul.f32 %v401_v43, %v237_v35  ;;  %v291_v51 = vmax.f32 %v290_v36, 0.0 }
  0xa3   :  { %v317_v47 = vadd.f32 %v412_v37, %v312_v40  ;;  %v344_v52 = vadd.f32 %v416_v44, %v339_v42 }
  0xa4   :  { %v162_v38 = vadd.f32 %v161_v31, %v135_v30  ;;  %v269_v54 = vmul.f32 %v405_v48, %v264_v2  ;;  %v296_v58 = vmul.f32 %v409_v41, %v291_v51 }
  0xa5   :  { %v318_v55 = vmax.f32 %v317_v47, 0.0  ;;  %v345_v59 = vmax.f32 %v344_v52, 0.0 }
  0xa6   :  { %v189_v45 = vadd.f32 %v188_v39, %v162_v38 }
  0xa7   :  { %v323_v62 = vmul.f32 %v413_v56, %v318_v55  ;;  %v350_v0 = vmul.f32 %v417_v60, %v345_v59 }
  0xa8   :  { %v216_v49 = vadd.f32 %v215_v46, %v189_v45 }
  0xaa   :  { %v243_v53 = vadd.f32 %v242_v50, %v216_v49 }
  0xac   :  { %v270_v57 = vadd.f32 %v269_v54, %v243_v53 }
  0xae   :  { %v297_v61 = vadd.f32 %v296_v58, %v270_v57 }
  0xb0   :  { %v324_v63 = vadd.f32 %v323_v62, %v297_v61 }
  0xb2   :  { %v351_v3 = vadd.f32 %v350_v0, %v324_v63 }
  0xb4   :  { %v357_v4 = vadd.f32 %v418_v1, %v351_v3 }
  0xb6   :  { %v358_v5 = vmax.f32 %v357_v4, 0.0 }
  0xb8   :  { %359 = vst [vmem:[#allocation7] sm:$0xff] %v358_v5 }
  0xb9   :  { %478 = shalt.err (!%p475_p0)
}
  0xba   :  { %369 = dma.vmem_to_hbm [thread:$0]  %s367_s22, 128, %s541_s2, [#allocation4]  }
  0xbb   :  { %491 = dma.done.wait [#allocation4], 128  }
  0xbc   :  { %492 = vsyncadd [#allocation4], 4294967168 }
  0xbd   :  { %373 = vsyncpa [#allocation3], 1 }
  0xbe   :  { %374 = vsyncpa [#allocation6], 1 }
  0xbf   :  { %375 = vsyncpa [#allocation4], 1 }

</bundles_post_ra>
